<compile_context>
chip_gen: v6e
topology: v6e:2x2x1
jax: 0.10.0
libtpu: 0.0.40
codegen_flags: <defaults>
</compile_context>

<pallas_src>
import math
from functools import partial

import jax
import jax.numpy as jnp
from jax.experimental import pallas as pl
from jax.experimental.pallas import tpu as pltpu


# Conservative, generation-agnostic budgets: the working set (all double-buffered
# streams) stays under 32 MiB, total scoped VMEM under 48 MiB -> safe on
# v5e/v6e (128 MiB phys, 16/32 MiB scoped default) and v7x (64 MiB phys).
_VMEM_BUDGET = 32 * 1024 * 1024
_VMEM_LIMIT = 48 * 1024 * 1024


# ---------------------------------------------------------------------------
# Tile-size helpers (VMEM- and dtype-aware)
# ---------------------------------------------------------------------------
def _row_multiple(dtype):
    """Sublane packing: fp32 -> 8, bf16 -> 16, int8/fp8 -> 32 rows."""
    itemsize = jnp.dtype(dtype).itemsize
    return max(8, 32 // max(1, itemsize))


def _row_block(rows, d, dtype, n_streams, cap=1024):
    """Largest row tile such that n_streams double-buffered (rb, d) tiles fit
    the VMEM budget.  Full extent if the whole array fits (always legal)."""
    itemsize = jnp.dtype(dtype).itemsize
    per_row = n_streams * 2 * d * itemsize            # double-buffered streams
    rb = max(1, min(cap, _VMEM_BUDGET // max(1, per_row)))
    if rows <= rb:
        return rows                                    # full extent
    mult = _row_multiple(dtype)
    return max(mult, (rb // mult) * mult)


# ---------------------------------------------------------------------------
# Kernels
# ---------------------------------------------------------------------------
def _layernorm_kernel(x_ref, a_ref, b_ref, o_ref, *, eps):
    # x_ref: (rb, D)   a_ref/b_ref: (1, D)   o_ref: (rb, D)
    x = x_ref[...].astype(jnp.float32)
    d = x.shape[-1]
    mean = jnp.mean(x, axis=-1, keepdims=True)
    xc = x - mean
    # torch.Tensor.std is unbiased: divide by (D - 1).  (max(...,1) only guards
    # the degenerate D==1 case against a trace-time div-by-zero.)
    var = jnp.sum(xc * xc, axis=-1, keepdims=True) * (1.0 / max(d - 1, 1))
    inv = 1.0 / (jnp.sqrt(var) + eps)                  # per-row (rb,1) reciprocal
    y = a_ref[...].astype(jnp.float32) * (xc * inv) + b_ref[...].astype(jnp.float32)
    o_ref[...] = y.astype(o_ref.dtype)


def _residual_add_kernel(x_ref, y_ref, o_ref):
    o_ref[...] = (x_ref[...].astype(jnp.float32)
                  + y_ref[...].astype(jnp.float32)).astype(o_ref.dtype)


def _residual_dropout_kernel(x_ref, y_ref, m_ref, o_ref):
    # m_ref holds the precomputed inverted-dropout mask: values in {0, 1/(1-p)}.
    x = x_ref[...].astype(jnp.float32)
    y = y_ref[...].astype(jnp.float32)
    m = m_ref[...].astype(jnp.float32)
    o_ref[...] = (x + y * m).astype(o_ref.dtype)


def _fused_body(x_ref, a_ref, b_ref, w_ref, bias_ref, m_ref, o_ref, eps, rn):
    # x_ref: (rm, D)  a/b: (1, D)  w_ref: (D, rn)  bias: (1, rn)  o_ref: (rm, rn)
    x = x_ref[...].astype(jnp.float32)
    d = x.shape[-1]
    mean = jnp.mean(x, axis=-1, keepdims=True)
    xc = x - mean
    var = jnp.sum(xc * xc, axis=-1, keepdims=True) * (1.0 / max(d - 1, 1))
    inv = 1.0 / (jnp.sqrt(var) + eps)                  # per-row reciprocal
    normed = a_ref[...].astype(jnp.float32) * (xc * inv) + b_ref[...].astype(jnp.float32)
    y = jnp.dot(normed.astype(w_ref.dtype), w_ref[...],
                preferred_element_type=jnp.float32)
    y = y + bias_ref[...].astype(jnp.float32)
    if m_ref is not None:
        y = y * m_ref[...].astype(jnp.float32)
    # Residual slice comes from the x block already resident in VMEM
    # (N == D for a residual connection), so x is only read once from HBM.
    col = pl.program_id(1) * rn
    if rn % 128 == 0:
        col = pl.multiple_of(col, 128)
    x_res = x_ref[:, pl.ds(col, rn)].astype(jnp.float32)
    o_ref[...] = (x_res + y).astype(o_ref.dtype)


def _fused_kernel_nomask(x_ref, a_ref, b_ref, w_ref, bias_ref, o_ref, *, eps, rn):
    _fused_body(x_ref, a_ref, b_ref, w_ref, bias_ref, None, o_ref, eps, rn)


def _fused_kernel_mask(x_ref, a_ref, b_ref, w_ref, bias_ref, m_ref, o_ref, *, eps, rn):
    _fused_body(x_ref, a_ref, b_ref, w_ref, bias_ref, m_ref, o_ref, eps, rn)


# ---------------------------------------------------------------------------
# pallas_call wrappers
# ---------------------------------------------------------------------------
def _pallas_layernorm(x2d, a2, b2, eps):
    r, d = x2d.shape
    itemsize = x2d.dtype.itemsize
    rb = _row_block(r, d, x2d.dtype, n_streams=2)
    grid = (pl.cdiv(r, rb),)
    bytes_accessed = 2 * r * d * itemsize + 2 * d * 4
    return pl.pallas_call(
        partial(_layernorm_kernel, eps=float(eps)),
        out_shape=jax.ShapeDtypeStruct((r, d), x2d.dtype),
        grid=grid,
        in_specs=[
            pl.BlockSpec((rb, d), lambda i: (i, 0)),
            pl.BlockSpec((1, d), lambda i: (0, 0)),
            pl.BlockSpec((1, d), lambda i: (0, 0)),
        ],
        out_specs=pl.BlockSpec((rb, d), lambda i: (i, 0)),
        compiler_params=pltpu.CompilerParams(
            dimension_semantics=("parallel",), vmem_limit_bytes=_VMEM_LIMIT),
        cost_estimate=pl.CostEstimate(flops=int(8 * r * d), transcendentals=int(r),
                                      bytes_accessed=int(bytes_accessed)),
    )(x2d, a2.reshape(1, d), b2.reshape(1, d))


def _pallas_residual(x2d, y2d, mask2d=None):
    r, d = x2d.shape
    itemsize = x2d.dtype.itemsize
    n_streams = 3 + (1 if mask2d is not None else 0)
    rb = _row_block(r, d, x2d.dtype, n_streams=n_streams)
    grid = (pl.cdiv(r, rb),)
    if mask2d is None:
        kernel = _residual_add_kernel
        operands = (x2d, y2d)
    else:
        kernel = _residual_dropout_kernel
        operands = (x2d, y2d, mask2d)
    in_specs = [pl.BlockSpec((rb, d), lambda i: (i, 0)) for _ in operands]
    bytes_accessed = (len(operands) + 1) * r * d * itemsize
    return pl.pallas_call(
        kernel,
        out_shape=jax.ShapeDtypeStruct((r, d), x2d.dtype),
        grid=grid,
        in_specs=in_specs,
        out_specs=pl.BlockSpec((rb, d), lambda i: (i, 0)),
        compiler_params=pltpu.CompilerParams(
            dimension_semantics=("parallel",), vmem_limit_bytes=_VMEM_LIMIT),
        cost_estimate=pl.CostEstimate(flops=int(2 * r * d), transcendentals=0,
                                      bytes_accessed=int(bytes_accessed)),
    )(*operands)


def _pallas_fused_ln_linear_residual(x2d, a2, b2, w_t, bias, mask2d, eps):
    """Single-kernel LayerNorm -> Linear -> (dropout mask) -> residual add.
    x2d: (R, D), w_t: (D, N) with N == D, bias: (N,)."""
    r, d = x2d.shape
    n = w_t.shape[1]
    if n != d:
        raise ValueError("fused path requires N == D (residual connection)")
    itemsize = x2d.dtype.itemsize

    # Column tile: lane-dense multiple of 128 dividing N, otherwise full N.
    if n % 128 == 0:
        rn = 128
        for cand in (512, 256, 128):
            if n % cand == 0:
                rn = cand
                break
        while rn > 128 and 2 * d * rn * itemsize > _VMEM_BUDGET // 2:
            rn //= 2
    else:
        rn = n

    # Row tile from the remaining VMEM budget (x block + out (+ mask), double-buffered).
    w_bytes = 2 * (d * rn + rn) * itemsize
    n_col_streams = 1 + (1 if mask2d is not None else 0)
    per_row = 2 * (d + n_col_streams * rn) * itemsize
    rm_max = max(1, (_VMEM_BUDGET - w_bytes) // max(1, per_row))
    mult = _row_multiple(x2d.dtype)
    rm = r if r <= rm_max else max(mult, min(512, (rm_max // mult) * mult))

    grid = (pl.cdiv(r, rm), n // rn)

    in_specs = [
        pl.BlockSpec((rm, d), lambda i, j: (i, 0)),   # x rows (also residual source)
        pl.BlockSpec((1, d), lambda i, j: (0, 0)),    # a_2
        pl.BlockSpec((1, d), lambda i, j: (0, 0)),    # b_2
        pl.BlockSpec((d, rn), lambda i, j: (0, j)),   # W^T column block
        pl.BlockSpec((1, rn), lambda i, j: (0, j)),   # bias
    ]
    operands = [x2d, a2.reshape(1, d), b2.reshape(1, d), w_t, bias.reshape(1, n)]
    if mask2d is not None:
        in_specs.append(pl.BlockSpec((rm, rn), lambda i, j: (i, j)))
        operands.append(mask2d)
        kernel = partial(_fused_kernel_mask, eps=float(eps), rn=rn)
    else:
        kernel = partial(_fused_kernel_nomask, eps=float(eps), rn=rn)

    flops = 2 * r * n * d + 10 * r * d
    bytes_accessed = (r * d * itemsize                      # x read once (row block cached over j)
                      + pl.cdiv(r, rm) * d * n * itemsize   # W^T re-read per row block
                      + r * n * itemsize                    # output
                      + (r * n * itemsize if mask2d is not None else 0)
                      + 2 * d * 4 + n * 4)

    return pl.pallas_call(
        kernel,
        out_shape=jax.ShapeDtypeStruct((r, n), x2d.dtype),
        grid=grid,
        in_specs=in_specs,
        out_specs=pl.BlockSpec((rm, rn), lambda i, j: (i, j)),
        compiler_params=pltpu.CompilerParams(
            dimension_semantics=("parallel", "parallel"),
            vmem_limit_bytes=_VMEM_LIMIT),
        cost_estimate=pl.CostEstimate(flops=int(flops), transcendentals=int(r),
                                      bytes_accessed=int(bytes_accessed)),
    )(*operands)


# ---------------------------------------------------------------------------
# Dropout mask (host-side)
# ---------------------------------------------------------------------------
def _make_dropout_mask(rng, rate, shape, dtype):
    # TODO(synk): ideally drawn in-kernel with the TPU hardware PRNG
    # (pltpu.prng_seed / prng_random_bits) to avoid an extra HBM stream, but the
    # sandbox's interpret/CPU lowering has no rule for prng_seed, so the
    # inverted-scale mask is precomputed host-side and streamed lane-dense.
    keep = jax.random.bernoulli(rng, 1.0 - rate, shape)
    return keep.astype(dtype) * (1.0 / (1.0 - rate))


# ---------------------------------------------------------------------------
# Public forward passes
# ---------------------------------------------------------------------------
def sublayer_connection_forward(x, a2, b2, sublayer_fn, *, dropout_rate=0.0,
                                eps=1e-6, deterministic=True, dropout_rng=None):
    """Generic path: out = x + dropout(sublayer(LayerNorm(x)))."""
    orig_shape = x.shape
    d = orig_shape[-1]
    x2d = x.reshape(-1, d)                       # free view, no transpose
    r = x2d.shape[0]
    normed = _pallas_layernorm(x2d, a2, b2, eps)
    # TODO(synk): an arbitrary `sublayer` callable cannot be fused into the
    # Pallas kernels generically; it runs as plain JAX between the two kernels.
    # Use sublayer_connection_linear_forward for the fused Linear fast path.
    y2d = sublayer_fn(normed.reshape(orig_shape)).reshape(-1, d)
    mask2d = None
    if (not deterministic) and dropout_rate > 0.0 and dropout_rng is not None:
        mask2d = _make_dropout_mask(dropout_rng, dropout_rate, (r, d), x2d.dtype)
    out2d = _pallas_residual(x2d, y2d, mask2d)
    return out2d.reshape(orig_shape)


def sublayer_connection_linear_forward(x, a2, b2, w, bias, *, dropout_rate=0.0,
                                       eps=1e-6, deterministic=True,
                                       dropout_rng=None):
    """Fused fast path for sublayer = nn.Linear(D, D):
       out = x + dropout(LayerNorm(x) @ W^T + bias), single pallas_call."""
    orig_shape = x.shape
    d = orig_shape[-1]
    x2d = x.reshape(-1, d)
    r = x2d.shape[0]
    w_t = jnp.asarray(w).T                       # (D_in, D_out), one-time transpose
    mask2d = None
    if (not deterministic) and dropout_rate > 0.0 and dropout_rng is not None:
        mask2d = _make_dropout_mask(dropout_rng, dropout_rate,
                                    (r, w_t.shape[1]), x2d.dtype)
    out2d = _pallas_fused_ln_linear_residual(x2d, a2, b2, w_t, bias, mask2d, eps)
    return out2d.reshape(orig_shape)


# ---------------------------------------------------------------------------
# Pure-JAX reference (matches the PyTorch module)
# ---------------------------------------------------------------------------
def _layernorm_reference(x, a2, b2, eps):
    d = x.shape[-1]
    mean = x.mean(-1, keepdims=True)
    var = ((x - mean) ** 2).sum(-1, keepdims=True) / max(d - 1, 1)  # unbiased std
    return a2 * (x - mean) / (jnp.sqrt(var) + eps) + b2


def sublayer_connection_reference(x, a2, b2, sublayer_fn, eps=1e-6, mask=None):
    y = sublayer_fn(_layernorm_reference(x, a2, b2, eps))
    if mask is not None:
        y = y * mask
    return x + y


if __name__ == "__main__":
    key = jax.random.PRNGKey(0)
    k_x, k_w, k_b, k_drop = jax.random.split(key, 4)

    B, S, D = 2, 8, 128
    x = jax.random.normal(k_x, (B, S, D), dtype=jnp.float32)

    # LayerNorm params exactly as in the module's init: ones / zeros.
    a2 = jnp.ones((D,), jnp.float32)
    b2 = jnp.zeros((D,), jnp.float32)

    # Demo sublayer: Linear(D, D) with torch-style weight layout (out, in).
    bound = 1.0 / math.sqrt(D)
    w = jax.random.uniform(k_w, (D, D), jnp.float32, -bound, bound)
    bias = jax.random.uniform(k_b, (D,), jnp.float32, -bound, bound)
    sublayer = lambda h: jnp.dot(h, w.T, precision=jax.lax.Precision.HIGHEST) + bias

    ref = sublayer_connection_reference(x, a2, b2, sublayer)

    # ---- eval mode, generic two-kernel path ----
    out_gen = sublayer_connection_forward(x, a2, b2, sublayer,
                                          dropout_rate=0.1, deterministic=True)
    out_gen = jax.block_until_ready(out_gen)
    assert out_gen.shape == (B, S, D), out_gen.shape
    err = float(jnp.max(jnp.abs(out_gen - ref)))
    assert err < 1e-4, f"generic path max abs error too large: {err}"

    # ---- eval mode, fused LN -> Linear -> residual path ----
    out_fused = sublayer_connection_linear_forward(x, a2, b2, w, bias,
                                                   dropout_rate=0.1,
                                                   deterministic=True)
    out_fused = jax.block_until_ready(out_fused)
    assert out_fused.shape == (B, S, D), out_fused.shape
    err_f = float(jnp.max(jnp.abs(out_fused - ref)))
    assert err_f < 2e-3, f"fused path max abs error too large: {err_f}"

    # ---- training mode (dropout active via precomputed inverted mask) ----
    rate = 0.5
    mask2d = _make_dropout_mask(k_drop, rate, (B * S, D), jnp.float32)
    ref_tr = sublayer_connection_reference(x, a2, b2, sublayer,
                                           mask=mask2d.reshape(B, S, D))

    out_tr = sublayer_connection_forward(x, a2, b2, sublayer, dropout_rate=rate,
                                         deterministic=False, dropout_rng=k_drop)
    out_tr = jax.block_until_ready(out_tr)
    err_tr = float(jnp.max(jnp.abs(out_tr - ref_tr)))
    assert err_tr < 1e-4, f"generic dropout path error too large: {err_tr}"

    out_trf = sublayer_connection_linear_forward(x, a2, b2, w, bias,
                                                 dropout_rate=rate,
                                                 deterministic=False,
                                                 dropout_rng=k_drop)
    out_trf = jax.block_until_ready(out_trf)
    err_trf = float(jnp.max(jnp.abs(out_trf - ref_tr)))
    assert err_trf < 2e-3, f"fused dropout path error too large: {err_trf}"
    assert bool(jnp.all(jnp.isfinite(out_trf)))

    print("KERNEL_OK")
</pallas_src>

<mosaic_0001>
module attributes {stable_mosaic.version = 11 : i64} {
  func.func @_layernorm_kernel(%arg0: i32, %arg1: memref<16x128xf32, #tpu.memory_space<vmem>>, %arg2: memref<1x128xf32, #tpu.memory_space<vmem>>, %arg3: memref<1x128xf32, #tpu.memory_space<vmem>>, %arg4: memref<16x128xf32, #tpu.memory_space<vmem>>) attributes {dimension_semantics = [#tpu.dimension_semantics<parallel>], iteration_bounds = array<i64: 1>, scalar_prefetch = 0 : i64, scratch_operands = 0 : i64, tpu.core_type = #tpu.core_type<tc>, window_params = [{transform_indices = @transform_0, window_bounds = array<i64: 16, 128>}, {pipeline_mode = #tpu.pipeline_mode<synchronous>, transform_indices = @transform_1, window_bounds = array<i64: 1, 128>}, {pipeline_mode = #tpu.pipeline_mode<synchronous>, transform_indices = @transform_2, window_bounds = array<i64: 1, 128>}, {transform_indices = @transform_3, window_bounds = array<i64: 16, 128>}]} {
    %c0 = arith.constant 0 : index
    %c0_0 = arith.constant 0 : index
    %0 = vector.load %arg1[%c0, %c0_0] : memref<16x128xf32, #tpu.memory_space<vmem>>, vector<16x128xf32>
    %cst = arith.constant dense<0.000000e+00> : vector<16xf32>
    %1 = vector.multi_reduction <add>, %0, %cst [1] : vector<16x128xf32> to vector<16xf32>
    %2 = vector.shape_cast %1 : vector<16xf32> to vector<16x1xf32>
    %cst_1 = arith.constant 1.280000e+02 : f32
    %3 = vector.broadcast %cst_1 : f32 to vector<16x1xf32>
    %4 = arith.divf %2, %3 : vector<16x1xf32>
    %5 = vector.broadcast %4 : vector<16x1xf32> to vector<16x128xf32>
    %6 = arith.subf %0, %5 : vector<16x128xf32>
    %7 = arith.mulf %6, %6 : vector<16x128xf32>
    %cst_2 = arith.constant dense<0.000000e+00> : vector<16xf32>
    %8 = vector.multi_reduction <add>, %7, %cst_2 [1] : vector<16x128xf32> to vector<16xf32>
    %9 = vector.shape_cast %8 : vector<16xf32> to vector<16x1xf32>
    %cst_3 = arith.constant 0.00787401571 : f32
    %10 = vector.broadcast %cst_3 : f32 to vector<16x1xf32>
    %11 = arith.mulf %9, %10 : vector<16x1xf32>
    %12 = math.sqrt %11 : vector<16x1xf32>
    %cst_4 = arith.constant 9.99999997E-7 : f32
    %13 = vector.broadcast %cst_4 : f32 to vector<16x1xf32>
    %14 = arith.addf %12, %13 : vector<16x1xf32>
    %cst_5 = arith.constant 1.000000e+00 : f32
    %15 = vector.broadcast %cst_5 : f32 to vector<16x1xf32>
    %16 = arith.divf %15, %14 : vector<16x1xf32>
    %c0_6 = arith.constant 0 : index
    %c0_7 = arith.constant 0 : index
    %17 = vector.load %arg2[%c0_6, %c0_7] : memref<1x128xf32, #tpu.memory_space<vmem>>, vector<1x128xf32>
    %18 = vector.broadcast %16 : vector<16x1xf32> to vector<16x128xf32>
    %19 = arith.mulf %6, %18 : vector<16x128xf32>
    %20 = vector.broadcast %17 : vector<1x128xf32> to vector<16x128xf32>
    %21 = arith.mulf %20, %19 : vector<16x128xf32>
    %c0_8 = arith.constant 0 : index
    %c0_9 = arith.constant 0 : index
    %22 = vector.load %arg3[%c0_8, %c0_9] : memref<1x128xf32, #tpu.memory_space<vmem>>, vector<1x128xf32>
    %23 = vector.broadcast %22 : vector<1x128xf32> to vector<16x128xf32>
    %24 = arith.addf %21, %23 : vector<16x128xf32>
    %c0_10 = arith.constant 0 : index
    %c0_11 = arith.constant 0 : index
    %25 = vector.load %arg4[%c0_10, %c0_11] : memref<16x128xf32, #tpu.memory_space<vmem>>, vector<16x128xf32>
    tpu.vector_store %arg4[%c0_10, %c0_11], %24 {strides = array<i32>} : memref<16x128xf32, #tpu.memory_space<vmem>>, vector<16x128xf32>,
    return
  }
  func.func @transform_0(%arg0: i32) -> (i32, i32) {
    %c0_i32 = arith.constant 0 : i32
    %c0_i32_0 = arith.constant 0 : i32
    return %arg0, %c0_i32 : i32, i32
  }
  func.func @transform_1(%arg0: i32) -> (i32, i32) {
    %c0_i32 = arith.constant 0 : i32
    %c0_i32_0 = arith.constant 0 : i32
    %c0_i32_1 = arith.constant 0 : i32
    return %c0_i32, %c0_i32_0 : i32, i32
  }
  func.func @transform_2(%arg0: i32) -> (i32, i32) {
    %c0_i32 = arith.constant 0 : i32
    %c0_i32_0 = arith.constant 0 : i32
    %c0_i32_1 = arith.constant 0 : i32
    return %c0_i32, %c0_i32_0 : i32, i32
  }
  func.func @transform_3(%arg0: i32) -> (i32, i32) {
    %c0_i32 = arith.constant 0 : i32
    %c0_i32_0 = arith.constant 0 : i32
    return %arg0, %c0_i32 : i32, i32
  }
}

</mosaic_0001>

<bundles_post_ra>
// kernel: tpu_custom_call.1
= control target key start
LH: loop header
LB: loop body
LE: loop exit
PB: predicated region body
PF: predicated region fallthrough
CT: control target
= control target key end

     0   :  { %8 = vsyncpa [#allocation3], 0  ;;  %s207_s0 = inlined_call_operand.hbm [shape: f32[16,128], index: 0, kind: input, shape index: {}]   ;;  %s208_s1 = inlined_call_operand.vmem [shape: f32[1,128], index: 1, kind: input, shape index: {}]   ;;  %s209_s2 = inlined_call_operand.vmem [shape: f32[1,128], index: 2, kind: input, shape index: {}]   ;;  %s210_s3 = inlined_call_operand.hbm [shape: f32[16,128], index: 3, kind: output, shape index: {}]  }
   0x1   :  { %9 = vsyncpa [#allocation4], 0  ;;  %s165_s12 = smov [#allocation2]  }
   0x2   :  { %s15_s13 = sshll.u32 %s165_s12, 4  ;;  %s16_s13 = int_to_ptr.vmem [resolvable:$true] %s15_s13 }
   0x3   :  { %s129_s14 = scalar_lea.vmem %s16_s13, 256  ;;  %p134_p1 = scmp.lt.s32.totalorder %s16_s13, %s16_s13 }
   0x4   :  { %p130_p0 = scmp.ne.s32.totalorder %s16_s13, %s129_s14  ;;  %p135_p2 = scmp.lt.s32.totalorder %s129_s14, %s129_s14 }
   0x6   :  { %p136_p3 = por %p135_p2, %p134_p1 }
   0x8   :  { %p137_p4 = pnand %p136_p3, %p130_p0 }
   0xa   :  { %140 = shalt.err (!%p137_p4)
}
   0xb   :  { %s166_s15 = smov 128   ;;  %s167_s16 = smov 8  }
   0xc   :  { %21 = dma.hbm_to_vmem [thread:$0]  %s207_s0, 256, %s16_s13, [#allocation3], %s166_s15, %s166_s15, %s167_s16  }
   0xd   :  { %161 = dma.done.wait [#allocation3], 256  }
   0xe   :  { %162 = vsyncadd [#allocation3], 4294967040  ;;  %v29_v0 = vld [vmem:[#allocation2] sm:$0xff]  ;;  %v30_v1 = vld [vmem:[#allocation2 + $0x8] sm:$0xff]  ;;  %s168_s22 = smov [#allocation5]  }
   0xf   :  { %31 = vadd.xlane.f32.xlu0 %v29_v0  ;;  %v107_v27 = vld [vmem:[%s208_s1] ss:$0 sm:$0xff]  ;;  %s95_s23 = sshll.u32 %s168_s22, 4  ;;  %s96_s23 = int_to_ptr.vmem [resolvable:$true] %s95_s23 }
  0x10   :  { %v108_v29 = vld [vmem:[%s209_s2] ss:$0 sm:$0xff]  ;;  %s141_s24 = scalar_lea.vmem %s96_s23, 256  ;;  %p146_p6 = scmp.lt.s32.totalorder %s96_s23, %s96_s23 }
  0x11   :  { %p142_p5 = scmp.ne.s32.totalorder %s96_s23, %s141_s24  ;;  %p147_p7 = scmp.lt.s32.totalorder %s141_s24, %s141_s24 }
  0x13   :  { %33 = vadd.xlane.f32.xlu0 %v30_v1  ;;  %p148_p8 = por %p147_p7, %p146_p6 }
  0x15   :  { %p149_p9 = pnand %p148_p8, %p142_p5 }
  0x98   :  { %v32_v2 = vpop.xlane.xlu0 %31 }
  0x99   :  { %v36_v3 = vmul.f32 0.0078125, %v32_v2 }
  0x9b   :  { %v38_v4 = vsub.f32 %v29_v0, %v36_v3 }
  0x9c   :  { %v34_v5 = vpop.xlane.xlu0 %33 }
  0x9d   :  { %v37_v6 = vmul.f32 0.0078125, %v34_v5  ;;  %v40_v7 = vmul.f32 %v38_v4, %v38_v4 }
  0x9f   :  { %v39_v8 = vsub.f32 %v30_v1, %v37_v6  ;;  %42 = vadd.xlane.f32.xlu1 %v40_v7 }
  0xa1   :  { %v41_v9 = vmul.f32 %v39_v8, %v39_v8 }
  0xa3   :  { %44 = vadd.xlane.f32.xlu1 %v41_v9 }
 0x128   :  { %v43_v10 = vpop.xlane.xlu1 %42 }
 0x129   :  { %v46_v11 = vmul.f32 0.007874016, %v43_v10 }
 0x12b   :  { %113 = vrsqrt.f32 %v46_v11  ;;  %vm50_vm0 = vcmp.eq.f32.partialorder %v46_v11, inf  ;;  %v53_v16 = vand.u32 2147483648, %v46_v11  ;;  %vm52_vm1 = vcmp.eq.f32.partialorder %v46_v11, 0.0 }
 0x12c   :  { %v45_v12 = vpop.xlane.xlu1 %44 }
 0x12d   :  { %v47_v13 = vmul.f32 0.007874016, %v45_v12 }
 0x12f   :  { %115 = vrsqrt.f32 %v47_v13  ;;  %vm57_vm2 = vcmp.eq.f32.partialorder %v47_v13, inf  ;;  %v60_v22 = vand.u32 2147483648, %v47_v13  ;;  %vm59_vm3 = vcmp.eq.f32.partialorder %v47_v13, 0.0 }
 0x138   :  { %v114_v14 = vpop.eup %113 }
 0x139   :  { %v49_v15 = vmul.f32 %v114_v14, %v46_v11 }
 0x13b   :  { %v51_v17 = vsel %vm50_vm0, %v46_v11, %v49_v15 }
 0x13c   :  { %v116_v18 = vpop.eup %115  ;;  %v54_v19 = vsel %vm52_vm1, %v53_v16, %v51_v17 }
 0x13d   :  { %v62_v20 = vadd.f32 1e-06, %v54_v19  ;;  %v56_v21 = vmul.f32 %v116_v18, %v47_v13 }
 0x13f   :  { %117 = vrcp.f32 %v62_v20  ;;  %v58_v23 = vsel %vm57_vm2, %v47_v13, %v56_v21 }
 0x140   :  { %v61_v24 = vsel %vm59_vm3, %v60_v22, %v58_v23 }
 0x141   :  { %v63_v25 = vadd.f32 1e-06, %v61_v24 }
 0x143   :  { %119 = vrcp.f32 %v63_v25 }
 0x14c   :  { %v118_v26 = vpop.eup %117 }
 0x14d   :  { %v69_v28 = vmul.f32 %v118_v26, %v38_v4 }
 0x14f   :  { %v77_v30 = vmul.f32 %v107_v27, %v69_v28 }
 0x150   :  { %v120_v31 = vpop.eup %119 }
 0x151   :  { %v70_v32 = vmul.f32 %v120_v31, %v39_v8  ;;  %v86_v33 = vadd.f32 %v108_v29, %v77_v30 }
 0x153   :  { %v78_v34 = vmul.f32 %v107_v27, %v70_v32  ;;  %88 = vst [vmem:[#allocation5] sm:$0xff] %v86_v33 }
 0x155   :  { %v87_v35 = vadd.f32 %v108_v29, %v78_v34 }
 0x157   :  { %89 = vst [vmem:[#allocation5 + $0x8] sm:$0xff] %v87_v35 }
 0x158   :  { %152 = shalt.err (!%p149_p9)
}
 0x159   :  { %101 = dma.vmem_to_hbm [thread:$0]  %s96_s23, 256, %s210_s3, [#allocation4], %s166_s15, %s166_s15, %s167_s16  }
 0x15a   :  { %163 = dma.done.wait [#allocation4], 256  }
 0x15b   :  { %164 = vsyncadd [#allocation4], 4294967040 }
 0x15c   :  { %105 = vsyncpa [#allocation3], 1 }
 0x15d   :  { %106 = vsyncpa [#allocation4], 1 }

</bundles_post_ra>
